<compile_context>
chip_gen: v7x
topology: tpu7x:2x2x1
jax: 0.10.0
libtpu: 0.0.40
codegen_flags: <defaults>
</compile_context>

<pallas_src>
import jax
import jax.numpy as jnp
from jax.experimental import pallas as pl
from jax.experimental.pallas import tpu as pltpu

EPS = 1e-3  # matches CharbonnierLoss_dwt(eps=0.001)


def _pair_combine(v, pair_mask):
    """For each adjacent lane pair (2k, 2k+1) produce the pair-sum at one of the
    two positions and (+/-) the pair-difference at the other.

    `pair_mask` marks the positions where the shift=(W-1) roll fetches the
    in-pair partner; since it is built with the same roll primitive, the result
    is correct regardless of the hardware rotate direction convention (signs of
    the difference may flip, which is irrelevant because values are squared)."""
    tw = v.shape[-1]
    fwd = pltpu.roll(v, shift=tw - 1, axis=1)   # one lane neighbor
    bwd = pltpu.roll(v, shift=1, axis=1)        # the opposite lane neighbor
    return jnp.where(pair_mask, v + fwd, v - bwd)


def _charbonnier_dwt_kernel(x_ref, y_ref, out_ref, acc_ref):
    i = pl.program_id(1)

    tr, tw = x_ref.shape
    half = tr // 2

    # Row-parity split via stride-2 sublane reads (no extra HBM pass).
    # Upcast after the load so bf16 inputs stay 16-bit across HBM/DMA.
    x_even = x_ref[pl.ds(0, half, stride=2), :].astype(jnp.float32)
    x_odd = x_ref[pl.ds(1, half, stride=2), :].astype(jnp.float32)
    y_even = y_ref[pl.ds(0, half, stride=2), :].astype(jnp.float32)
    y_odd = y_ref[pl.ds(1, half, stride=2), :].astype(jnp.float32)

    # DWT is linear: butterfly the scaled difference once.
    d_even = (x_even - y_even) * 0.5        # d1 (even cols) | d3 (odd cols)
    d_odd = (x_odd - y_odd) * 0.5           # d2 (even cols) | d4 (odd cols)

    row_sum = d_even + d_odd                # d1+d2 | d3+d4
    row_dif = d_odd - d_even                # d2-d1 | d4-d3

    # Roll-direction-agnostic lane-pair mask (partner <=> lane index XOR 1).
    col = jax.lax.broadcasted_iota(jnp.int32, (half, tw), 1)
    col_fwd = pltpu.roll(col, shift=tw - 1, axis=1)
    pair_mask = col_fwd == (col ^ 1)

    band_a = _pair_combine(row_sum, pair_mask)   # +/-LL | +/-HL (one per lane)
    band_b = _pair_combine(row_dif, pair_mask)   # +/-LH | +/-HH (one per lane)

    eps2 = jnp.float32(EPS * EPS)
    contrib = jnp.sqrt(band_a * band_a + eps2) + jnp.sqrt(band_b * band_b + eps2)

    @pl.when(i == 0)
    def _():
        acc_ref[...] = jnp.zeros_like(acc_ref)

    acc_ref[...] += contrib

    @pl.when(i == pl.num_programs(1) - 1)
    def _():
        total = jnp.sum(acc_ref[...])
        out_ref[...] = jnp.broadcast_to(total, out_ref.shape).astype(out_ref.dtype)


def _choose_row_tile(n_rows, n_cols, max_block_elems):
    """Largest row tile that divides n_rows, keeps the 8-sublane layout rule and
    fits the per-buffer element budget (prefer TR % 16 == 0 so TR//2 is sublane
    aligned)."""
    budget_rows = max(2, max_block_elems // max(n_cols, 1))
    for step in (16, 8):
        cands = [d for d in range(step, n_rows + 1, step)
                 if n_rows % d == 0 and d <= budget_rows]
        if cands:
            return max(cands)
    return n_rows  # full axis is always a legal block dimension


def charbonnier_loss_dwt(x, y, *, max_block_elems=512 * 1024):
    """x, y: (B, C, H, W) arrays (NCHW, H and W even, W >= 4). Returns scalar f32."""
    assert x.shape == y.shape
    B, C, H, W = x.shape
    assert H % 2 == 0 and W % 2 == 0, "DWT requires even spatial dims"
    assert W >= 4, "lane-pair combine requires W >= 4"

    R = B * C * H                    # flattened rows; parity preserved since H is even
    xr = x.reshape(R, W)             # free reshape, no HBM copy
    yr = y.reshape(R, W)

    tr = _choose_row_tile(R, W, max_block_elems)
    n_blocks = R // tr
    p = 2 if (n_blocks >= 2 and n_blocks % 2 == 0) else 1   # megacore slices (v7x)
    nb = n_blocks // p

    in_spec = pl.BlockSpec((tr, W), lambda pi, i: (pi * nb + i, 0))

    out = pl.pallas_call(
        _charbonnier_dwt_kernel,
        out_shape=jax.ShapeDtypeStruct((p, 8, 128), jnp.float32),
        grid_spec=pltpu.PrefetchScalarGridSpec(
            num_scalar_prefetch=0,
            grid=(p, nb),
            in_specs=[in_spec, in_spec],
            out_specs=pl.BlockSpec((1, 8, 128), lambda pi, i: (pi, 0, 0)),
            scratch_shapes=[pltpu.VMEM((tr // 2, W), jnp.float32)],
        ),
        compiler_params=pltpu.CompilerParams(
            dimension_semantics=("parallel", "arbitrary"),
            vmem_limit_bytes=32 * 1024 * 1024,
        ),
    )(xr, yr)

    # Each of the 4 band means divides by the same count -> sum of means == total / n.
    n_per_band = B * C * (H // 2) * (W // 2)
    return jnp.sum(out[:, 0, 0]) / jnp.float32(n_per_band)


def _reference_loss(x, y):
    # Pure-JAX mirror of the PyTorch module.
    def dwt(v):
        x01 = v[:, :, 0::2, :] / 2
        x02 = v[:, :, 1::2, :] / 2
        x1 = x01[:, :, :, 0::2]
        x2 = x02[:, :, :, 0::2]
        x3 = x01[:, :, :, 1::2]
        x4 = x02[:, :, :, 1::2]
        return [x1 + x2 + x3 + x4, -x1 - x2 + x3 + x4,
                -x1 + x2 - x3 + x4, x1 - x2 - x3 + x4]

    xf = dwt(x)
    yf = dwt(y)
    return sum(jnp.mean(jnp.sqrt((xf[j] - yf[j]) ** 2 + EPS * EPS)) for j in range(4))


if __name__ == "__main__":
    key = jax.random.PRNGKey(0)
    k1, k2, k3, k4 = jax.random.split(key, 4)

    # Test 1: nominal small shape; single block, single slice.
    x = jax.random.normal(k1, (2, 4, 16, 16), dtype=jnp.float32)
    y = jax.random.normal(k2, (2, 4, 16, 16), dtype=jnp.float32)
    loss = jax.block_until_ready(charbonnier_loss_dwt(x, y))
    ref = jax.block_until_ready(_reference_loss(x, y))
    assert jnp.allclose(loss, ref, rtol=1e-5, atol=1e-5), (loss, ref)

    # Test 2: force multiple row blocks + 2 parallel slices (exercises the
    # accumulate / finalize path and the per-slice partial sums).
    x2 = jax.random.normal(k3, (2, 2, 16, 64), dtype=jnp.float32)
    y2 = jax.random.normal(k4, (2, 2, 16, 64), dtype=jnp.float32)
    loss2 = jax.block_until_ready(charbonnier_loss_dwt(x2, y2, max_block_elems=1024))
    ref2 = jax.block_until_ready(_reference_loss(x2, y2))
    assert jnp.allclose(loss2, ref2, rtol=1e-5, atol=1e-5), (loss2, ref2)

    print("KERNEL_OK")
</pallas_src>

<mosaic_0001>
module attributes {stable_mosaic.version = 11 : i64} {
  func.func @_charbonnier_dwt_kernel(%arg0: i32, %arg1: i32, %arg2: memref<128x16xf32, #tpu.memory_space<vmem>>, %arg3: memref<128x16xf32, #tpu.memory_space<vmem>>, %arg4: memref<1x8x128xf32, #tpu.memory_space<vmem>>, %arg5: memref<64x16xf32, #tpu.memory_space<vmem>>) attributes {dimension_semantics = [#tpu.dimension_semantics<parallel>, #tpu.dimension_semantics<arbitrary>], iteration_bounds = array<i64: 1, 1>, scalar_prefetch = 0 : i64, scratch_operands = 1 : i64, tpu.core_type = #tpu.core_type<tc>, window_params = [{transform_indices = @transform_0, window_bounds = array<i64: 128, 16>}, {transform_indices = @transform_1, window_bounds = array<i64: 128, 16>}, {transform_indices = @transform_2, window_bounds = array<i64: 1, 8, 128>}]} {
    %c0 = arith.constant 0 : index
    %c0_0 = arith.constant 0 : index
    %0 = tpu.strided_load %arg2[%c0, %c0_0] {strides = array<i32: 2, 1>} : memref<128x16xf32, #tpu.memory_space<vmem>>, vector<64x16xf32>
    %c1 = arith.constant 1 : index
    %c0_1 = arith.constant 0 : index
    %1 = tpu.strided_load %arg2[%c1, %c0_1] {strides = array<i32: 2, 1>} : memref<128x16xf32, #tpu.memory_space<vmem>>, vector<64x16xf32>
    %c0_2 = arith.constant 0 : index
    %c0_3 = arith.constant 0 : index
    %2 = tpu.strided_load %arg3[%c0_2, %c0_3] {strides = array<i32: 2, 1>} : memref<128x16xf32, #tpu.memory_space<vmem>>, vector<64x16xf32>
    %c1_4 = arith.constant 1 : index
    %c0_5 = arith.constant 0 : index
    %3 = tpu.strided_load %arg3[%c1_4, %c0_5] {strides = array<i32: 2, 1>} : memref<128x16xf32, #tpu.memory_space<vmem>>, vector<64x16xf32>
    %4 = arith.subf %0, %2 : vector<64x16xf32>
    %cst = arith.constant 5.000000e-01 : f32
    %5 = vector.broadcast %cst : f32 to vector<64x16xf32>
    %6 = arith.mulf %4, %5 : vector<64x16xf32>
    %7 = arith.subf %1, %3 : vector<64x16xf32>
    %cst_6 = arith.constant 5.000000e-01 : f32
    %8 = vector.broadcast %cst_6 : f32 to vector<64x16xf32>
    %9 = arith.mulf %7, %8 : vector<64x16xf32>
    %10 = arith.addf %6, %9 : vector<64x16xf32>
    %11 = arith.subf %9, %6 : vector<64x16xf32>
    %12 = tpu.iota {dimensions = array<i32: 1>} : vector<64x16xi32>
    %c15_i32 = arith.constant 15 : i32
    %13 = tpu.dynamic_rotate %12 by %c15_i32 dim 1 : vector<64x16xi32>, i32 -> vector<64x16xi32>
    %c1_i32 = arith.constant 1 : i32
    %14 = vector.broadcast %c1_i32 : i32 to vector<64x16xi32>
    %15 = arith.xori %12, %14 : vector<64x16xi32>
    %16 = arith.cmpi eq, %13, %15 : vector<64x16xi32>
    %c15_i32_7 = arith.constant 15 : i32
    %17 = tpu.dynamic_rotate %10 by %c15_i32_7 dim 1 : vector<64x16xf32>, i32 -> vector<64x16xf32>
    %c1_i32_8 = arith.constant 1 : i32
    %18 = tpu.dynamic_rotate %10 by %c1_i32_8 dim 1 : vector<64x16xf32>, i32 -> vector<64x16xf32>
    %19 = arith.addf %10, %17 : vector<64x16xf32>
    %20 = arith.subf %10, %18 : vector<64x16xf32>
    %21 = arith.select %16, %19, %20 : vector<64x16xi1>, vector<64x16xf32>
    %c15_i32_9 = arith.constant 15 : i32
    %22 = tpu.dynamic_rotate %11 by %c15_i32_9 dim 1 : vector<64x16xf32>, i32 -> vector<64x16xf32>
    %c1_i32_10 = arith.constant 1 : i32
    %23 = tpu.dynamic_rotate %11 by %c1_i32_10 dim 1 : vector<64x16xf32>, i32 -> vector<64x16xf32>
    %24 = arith.addf %11, %22 : vector<64x16xf32>
    %25 = arith.subf %11, %23 : vector<64x16xf32>
    %26 = arith.select %16, %24, %25 : vector<64x16xi1>, vector<64x16xf32>
    %27 = arith.mulf %21, %21 : vector<64x16xf32>
    %cst_11 = arith.constant 9.99999997E-7 : f32
    %28 = vector.broadcast %cst_11 : f32 to vector<64x16xf32>
    %29 = arith.addf %27, %28 : vector<64x16xf32>
    %30 = math.sqrt %29 : vector<64x16xf32>
    %31 = arith.mulf %26, %26 : vector<64x16xf32>
    %cst_12 = arith.constant 9.99999997E-7 : f32
    %32 = vector.broadcast %cst_12 : f32 to vector<64x16xf32>
    %33 = arith.addf %31, %32 : vector<64x16xf32>
    %34 = math.sqrt %33 : vector<64x16xf32>
    %35 = arith.addf %30, %34 : vector<64x16xf32>
    %c0_i32 = arith.constant 0 : i32
    %36 = arith.cmpi eq, %arg1, %c0_i32 : i32
    %37 = arith.extui %36 : i1 to i32
    %c0_i32_13 = arith.constant 0 : i32
    %38 = arith.cmpi ne, %37, %c0_i32_13 : i32
    scf.if %38 {
      %cst_20 = arith.constant 0.000000e+00 : f32
      %45 = vector.broadcast %cst_20 : f32 to vector<64x16xf32>
      %c0_21 = arith.constant 0 : index
      %c0_22 = arith.constant 0 : index
      %46 = vector.load %arg5[%c0_21, %c0_22] : memref<64x16xf32, #tpu.memory_space<vmem>>, vector<64x16xf32>
      tpu.vector_store %arg5[%c0_21, %c0_22], %45 {strides = array<i32>} : memref<64x16xf32, #tpu.memory_space<vmem>>, vector<64x16xf32>,
    } else {
    }
    %c0_14 = arith.constant 0 : index
    %c0_15 = arith.constant 0 : index
    %39 = vector.load %arg5[%c0_14, %c0_15] : memref<64x16xf32, #tpu.memory_space<vmem>>, vector<64x16xf32>
    %40 = arith.addf %39, %35 : vector<64x16xf32>
    %c0_16 = arith.constant 0 : index
    %c0_17 = arith.constant 0 : index
    %41 = vector.load %arg5[%c0_16, %c0_17] : memref<64x16xf32, #tpu.memory_space<vmem>>, vector<64x16xf32>
    tpu.vector_store %arg5[%c0_16, %c0_17], %40 {strides = array<i32>} : memref<64x16xf32, #tpu.memory_space<vmem>>, vector<64x16xf32>,
    %c0_i32_18 = arith.constant 0 : i32
    %42 = arith.cmpi eq, %arg1, %c0_i32_18 : i32
    %43 = arith.extui %42 : i1 to i32
    %c0_i32_19 = arith.constant 0 : i32
    %44 = arith.cmpi ne, %43, %c0_i32_19 : i32
    scf.if %44 {
      %c0_20 = arith.constant 0 : index
      %c0_21 = arith.constant 0 : index
      %45 = vector.load %arg5[%c0_20, %c0_21] : memref<64x16xf32, #tpu.memory_space<vmem>>, vector<64x16xf32>
      %46 = vector.shape_cast %45 : vector<64x16xf32> to vector<1x64x16xf32>
      %cst_22 = arith.constant dense<0.000000e+00> : vector<1xf32>
      %47 = vector.multi_reduction <add>, %46, %cst_22 [1, 2] : vector<1x64x16xf32> to vector<1xf32>
      %48 = vector.shape_cast %47 : vector<1xf32> to vector<1x1x1xf32>
      %49 = vector.extract %48[0, 0, 0] : f32 from vector<1x1x1xf32>
      %50 = vector.broadcast %49 : f32 to vector<1x8x128xf32>
      %c0_23 = arith.constant 0 : index
      %c0_24 = arith.constant 0 : index
      %c0_25 = arith.constant 0 : index
      %51 = vector.load %arg4[%c0_23, %c0_24, %c0_25] : memref<1x8x128xf32, #tpu.memory_space<vmem>>, vector<1x8x128xf32>
      tpu.vector_store %arg4[%c0_23, %c0_24, %c0_25], %50 {strides = array<i32>} : memref<1x8x128xf32, #tpu.memory_space<vmem>>, vector<1x8x128xf32>,
    } else {
    }
    return
  }
  func.func @transform_0(%arg0: i32, %arg1: i32) -> (i32, i32) {
    %c1_i32 = arith.constant 1 : i32
    %0 = arith.muli %arg0, %c1_i32 : i32
    %1 = arith.addi %0, %arg1 : i32
    %c0_i32 = arith.constant 0 : i32
    %c0_i32_0 = arith.constant 0 : i32
    return %1, %c0_i32 : i32, i32
  }
  func.func @transform_1(%arg0: i32, %arg1: i32) -> (i32, i32) {
    %c1_i32 = arith.constant 1 : i32
    %0 = arith.muli %arg0, %c1_i32 : i32
    %1 = arith.addi %0, %arg1 : i32
    %c0_i32 = arith.constant 0 : i32
    %c0_i32_0 = arith.constant 0 : i32
    return %1, %c0_i32 : i32, i32
  }
  func.func @transform_2(%arg0: i32, %arg1: i32) -> (i32, i32, i32) {
    %c0_i32 = arith.constant 0 : i32
    %c0_i32_0 = arith.constant 0 : i32
    %c0_i32_1 = arith.constant 0 : i32
    return %arg0, %c0_i32, %c0_i32_0 : i32, i32, i32
  }
}

</mosaic_0001>

<bundles_post_ra>
// kernel: tpu_custom_call.1
= control target key start
LH: loop header
LB: loop body
LE: loop exit
PB: predicated region body
PF: predicated region fallthrough
CT: control target
= control target key end

     0   :  { %s942_s13 = smov 16   ;;  %s1422_s0 = inlined_call_operand.vmem [shape: f32[128,16], index: 0, kind: input, shape index: {}]   ;;  %s1423_s1 = inlined_call_operand.vmem [shape: f32[128,16], index: 1, kind: input, shape index: {}]   ;;  %s1424_s2 = inlined_call_operand.hbm [shape: f32[1,8,128], index: 2, kind: output, shape index: {}]  }
   0x1   :  { %v56_v0 = vld [vmem:[%s1422_s0] ss:$2 sm:$0xff]  ;;  %v855_v1 = vld [vmem:[%s1422_s0 + $0x1] ss:$2 sm:$0xff]  ;;  %v848_v5 = vld [vmem:[%s1422_s0 + $0x10] ss:$2 sm:$0xff] }
   0x2   :  { %v87_v2 = vld [vmem:[%s1423_s1] ss:$2 sm:$0xff]  ;;  %v870_v3 = vld [vmem:[%s1423_s1 + $0x1] ss:$2 sm:$0xff]  ;;  %v856_v7 = vld [vmem:[%s1422_s0 + $0x11] ss:$2 sm:$0xff] }
   0x3   :  { %v118_v4 = vsub.f32 %v56_v0, %v87_v2  ;;  %v134_v6 = vsub.f32 %v855_v1, %v870_v3  ;;  %v863_v8 = vld [vmem:[%s1423_s1 + $0x10] ss:$2 sm:$0xff]  ;;  %v871_v9 = vld [vmem:[%s1423_s1 + $0x11] ss:$2 sm:$0xff]  ;;  %v849_v13 = vld [vmem:[%s1422_s0 + $0x20] ss:$2 sm:$0xff] }
   0x4   :  { %v119_v11 = vsub.f32 %v848_v5, %v863_v8  ;;  %v135_v12 = vsub.f32 %v856_v7, %v871_v9  ;;  %v857_v14 = vld [vmem:[%s1422_s0 + $0x21] ss:$2 sm:$0xff]  ;;  %v864_v16 = vld [vmem:[%s1423_s1 + $0x20] ss:$2 sm:$0xff]  ;;  %v850_v22 = vld [vmem:[%s1422_s0 + $0x30] ss:$2 sm:$0xff] }
   0x5   :  { %v126_v10 = vmul.f32 0.5, %v118_v4  ;;  %v142_v15 = vmul.f32 0.5, %v134_v6  ;;  %v872_v17 = vld [vmem:[%s1423_s1 + $0x21] ss:$2 sm:$0xff]  ;;  %v120_v20 = vsub.f32 %v849_v13, %v864_v16  ;;  %v858_v23 = vld [vmem:[%s1422_s0 + $0x31] ss:$2 sm:$0xff] }
   0x6   :  { %v127_v18 = vmul.f32 0.5, %v119_v11  ;;  %v143_v19 = vmul.f32 0.5, %v135_v12  ;;  %v136_v21 = vsub.f32 %v857_v14, %v872_v17  ;;  %v865_v26 = vld [vmem:[%s1423_s1 + $0x30] ss:$2 sm:$0xff]  ;;  %v873_v27 = vld [vmem:[%s1423_s1 + $0x31] ss:$2 sm:$0xff] }
   0x7   :  { %v1005_v24 = vadd.f32 %v142_v15, %v126_v10  ;;  %v1007_v25 = vsub.f32 %v142_v15, %v126_v10  ;;  %v128_v29 = vmul.f32 0.5, %v120_v20  ;;  %v121_v31 = vsub.f32 %v850_v22, %v865_v26  ;;  %v851_v33 = vld [vmem:[%s1422_s0 + $0x40] ss:$2 sm:$0xff]  ;;  %v859_v36 = vld [vmem:[%s1422_s0 + $0x41] ss:$2 sm:$0xff] }
   0x8   :  { %v1015_v28 = vadd.f32 %v143_v19, %v127_v18  ;;  %v144_v30 = vmul.f32 0.5, %v136_v21  ;;  %v137_v32 = vsub.f32 %v858_v23, %v873_v27  ;;  %v866_v34 = vld [vmem:[%s1423_s1 + $0x40] ss:$2 sm:$0xff]  ;;  %v1027_v35 = vsub.f32 %v143_v19, %v127_v18  ;;  %v874_v37 = vld [vmem:[%s1423_s1 + $0x41] ss:$2 sm:$0xff] }
   0x9   :  { %179 = vrot.lane.b32.xlu0 %v1005_v24, %s942_s13  ;;  %371 = vrot.lane.b32.xlu1 %v1007_v25, %s942_s13  ;;  %v122_v39 = vsub.f32 %v851_v33, %v866_v34  ;;  %v129_v40 = vmul.f32 0.5, %v121_v31  ;;  %v138_v42 = vsub.f32 %v859_v36, %v874_v37  ;;  %v852_v43 = vld [vmem:[%s1422_s0 + $0x50] ss:$2 sm:$0xff]  ;;  %v860_v46 = vld [vmem:[%s1422_s0 + $0x51] ss:$2 sm:$0xff] }
   0xa   :  { %v1035_v38 = vadd.f32 %v144_v30, %v128_v29  ;;  %v145_v41 = vmul.f32 0.5, %v137_v32  ;;  %v867_v44 = vld [vmem:[%s1423_s1 + $0x50] ss:$2 sm:$0xff]  ;;  %v1047_v45 = vsub.f32 %v144_v30, %v128_v29  ;;  %v875_v47 = vld [vmem:[%s1423_s1 + $0x51] ss:$2 sm:$0xff] }
   0xd   :  { %182 = vrot.lane.b32.xlu0 %v1015_v28, %s942_s13  ;;  %374 = vrot.lane.b32.xlu1 %v1027_v35, %s942_s13 }
   0xe   :  { %7 = vsyncpa [#allocation4], 0  ;;  %v130_v48 = vmul.f32 0.5, %v122_v39  ;;  %v123_v49 = vsub.f32 %v852_v43, %v867_v44  ;;  %v1057_v50 = vadd.f32 %v145_v41, %v129_v40  ;;  %v146_v51 = vmul.f32 0.5, %v138_v42  ;;  %v853_v53 = vld [vmem:[%s1422_s0 + $0x60] ss:$2 sm:$0xff] }
   0xf   :  { %v139_v52 = vsub.f32 %v860_v46, %v875_v47  ;;  %v868_v54 = vld [vmem:[%s1423_s1 + $0x60] ss:$2 sm:$0xff]  ;;  %v1067_v55 = vsub.f32 %v145_v41, %v129_v40  ;;  %v861_v56 = vld [vmem:[%s1422_s0 + $0x61] ss:$2 sm:$0xff]  ;;  %v854_v63 = vld [vmem:[%s1422_s0 + $0x70] ss:$2 sm:$0xff]  ;;  %v166_v15 = vlaneseq }
  0x10   :  { %v876_v57 = vld [vmem:[%s1423_s1 + $0x61] ss:$2 sm:$0xff]  ;;  %v131_v58 = vmul.f32 0.5, %v123_v49  ;;  %v124_v59 = vsub.f32 %v853_v53, %v868_v54  ;;  %v1077_v60 = vadd.f32 %v146_v51, %v130_v48  ;;  %v869_v0 = vld [vmem:[%s1423_s1 + $0x70] ss:$2 sm:$0xff]  ;;  %v1087_v1 = vsub.f32 %v146_v51, %v130_v48  ;;  %s945_s19 = smov 113  }
  0x11   :  { %185 = vrot.lane.b32.xlu0 %v1035_v38, %s942_s13  ;;  %377 = vrot.lane.b32.xlu1 %v1047_v45, %s942_s13  ;;  %v147_v61 = vmul.f32 0.5, %v139_v52  ;;  %v140_v62 = vsub.f32 %v861_v56, %v876_v57  ;;  %v862_v2 = vld [vmem:[%s1422_s0 + $0x71] ss:$2 sm:$0xff]  ;;  %v125_v5 = vsub.f32 %v854_v63, %v869_v0  ;;  %v1121_v17 = vand.u32 127, %v166_v15  ;;  %s943_s0 = smov 1  }
  0x12   :  { %v877_v3 = vld [vmem:[%s1423_s1 + $0x71] ss:$2 sm:$0xff]  ;;  %v132_v4 = vmul.f32 0.5, %v124_v59  ;;  %vm168_vm0 = vcmask 1047680   ;;  %s944_s1 = smov 127   ;;  %vm719_vm2 = vcmask 130048  }
  0x13   :  { %v1097_v6 = vadd.f32 %v147_v61, %v131_v58  ;;  %v148_v7 = vmul.f32 0.5, %v140_v62  ;;  %v141_v8 = vsub.f32 %v862_v2, %v877_v3  ;;  %v1101_v9 = vsub.f32 %v147_v61, %v131_v58 }
  0x14   :  { %v133_v11 = vmul.f32 0.5, %v125_v5  ;;  %v175_v18 = vxor.u32 1, %v1121_v17 }
  0x15   :  { %188 = vrot.lane.b32.xlu0 %v1057_v50, %s942_s13  ;;  %380 = vrot.lane.b32.xlu1 %v1067_v55, %s942_s13  ;;  %v1105_v10 = vadd.f32 %v148_v7, %v132_v4  ;;  %v149_v12 = vmul.f32 0.5, %v141_v8  ;;  %v1109_v13 = vsub.f32 %v148_v7, %v132_v4 }
  0x17   :  { %v1113_v14 = vadd.f32 %v149_v12, %v133_v11  ;;  %v1117_v16 = vsub.f32 %v149_v12, %v133_v11 }
  0x19   :  { %191 = vrot.lane.b32.xlu0 %v1077_v60, %s942_s13  ;;  %383 = vrot.lane.b32.xlu1 %v1087_v1, %s942_s13 }
  0x1d   :  { %194 = vrot.lane.b32.xlu0 %v1097_v6, %s942_s13  ;;  %386 = vrot.lane.b32.xlu1 %v1101_v9, %s942_s13 }
  0x21   :  { %197 = vrot.lane.b32.xlu0 %v1105_v10, %s942_s13  ;;  %389 = vrot.lane.b32.xlu1 %v1109_v13, %s942_s13 }
  0x25   :  { %200 = vrot.lane.b32.xlu0 %v1113_v14, %s942_s13  ;;  %392 = vrot.lane.b32.xlu1 %v1117_v16, %s942_s13 }
  0x29   :  { %169 = vrot.lane.b32.xlu0 %v1121_v17, %s942_s13 }
  0x2d   :  { %176 = vrot.lane.b32.xlu0 %v175_v18, %s943_s0 }
  0x7b   :  { %v180_v19 = vpop.permute.xlu0 %179  ;;  %v372_v20 = vpop.permute.xlu1 %371 }
  0x7c   :  { %v181_v21 = vsel %vm168_vm0, %v180_v19, %v1005_v24  ;;  %v373_v22 = vsel %vm168_vm0, %v372_v20, %v1007_v25 }
  0x7d   :  { %203 = vrot.lane.b32.xlu0 %v181_v21, %s942_s13 }
  0x7f   :  { %v183_v23 = vpop.permute.xlu0 %182  ;;  %v375_v43 = vpop.permute.xlu1 %374 }
  0x80   :  { %v184_v44 = vsel %vm168_vm0, %v183_v23, %v1015_v28  ;;  %v376_v46 = vsel %vm168_vm0, %v375_v43, %v1027_v35 }
  0x81   :  { %395 = vrot.lane.b32.xlu0 %v373_v22, %s942_s13 }
  0x83   :  { %v186_v26 = vpop.permute.xlu0 %185  ;;  %v378_v47 = vpop.permute.xlu1 %377 }
  0x84   :  { %v187_v27 = vsel %vm168_vm0, %v186_v26, %v1035_v38  ;;  %v379_v48 = vsel %vm168_vm0, %v378_v47, %v1047_v45 }
  0x85   :  { %207 = vrot.lane.b32.xlu0 %v187_v27, %s942_s13 }
  0x87   :  { %v189_v29 = vpop.permute.xlu0 %188  ;;  %v381_v49 = vpop.permute.xlu1 %380 }
  0x88   :  { %v190_v30 = vsel %vm168_vm0, %v189_v29, %v1057_v50  ;;  %v382_v51 = vsel %vm168_vm0, %v381_v49, %v1067_v55 }
  0x89   :  { %209 = vrot.lane.b32.xlu0 %v190_v30, %s942_s13 }
  0x8b   :  { %v192_v31 = vpop.permute.xlu0 %191  ;;  %v384_v52 = vpop.permute.xlu1 %383 }
  0x8c   :  { %v193_v32 = vsel %vm168_vm0, %v192_v31, %v1077_v60  ;;  %v385_v53 = vsel %vm168_vm0, %v384_v52, %v1087_v1 }
  0x8d   :  { %211 = vrot.lane.b32.xlu0 %v193_v32, %s942_s13 }
  0x8f   :  { %v195_v33 = vpop.permute.xlu0 %194  ;;  %v387_v54 = vpop.permute.xlu1 %386 }
  0x90   :  { %v196_v34 = vsel %vm168_vm0, %v195_v33, %v1097_v6  ;;  %v388_v56 = vsel %vm168_vm0, %v387_v54, %v1101_v9 }
  0x91   :  { %213 = vrot.lane.b32.xlu0 %v196_v34, %s942_s13 }
  0x93   :  { %v198_v36 = vpop.permute.xlu0 %197  ;;  %v390_v57 = vpop.permute.xlu1 %389 }
  0x94   :  { %v199_v37 = vsel %vm168_vm0, %v198_v36, %v1105_v10  ;;  %v391_v58 = vsel %vm168_vm0, %v390_v57, %v1109_v13 }
  0x95   :  { %215 = vrot.lane.b32.xlu0 %v199_v37, %s942_s13 }
  0x97   :  { %v201_v39 = vpop.permute.xlu0 %200  ;;  %v393_v59 = vpop.permute.xlu1 %392 }
  0x98   :  { %v202_v40 = vsel %vm168_vm0, %v201_v39, %v1113_v14  ;;  %v394_v61 = vsel %vm168_vm0, %v393_v59, %v1117_v16 }
  0x99   :  { %217 = vrot.lane.b32.xlu0 %v202_v40, %s942_s13 }
  0x9b   :  { %v170_v41 = vpop.permute.xlu0 %169 }
  0x9c   :  { %v171_v42 = vsel %vm168_vm0, %v170_v41, %v1121_v17 }
  0x9d   :  { %172 = vrot.lane.b32.xlu1 %v171_v42, %s942_s13 }
  0x9f   :  { %v177_v62 = vpop.permute.xlu0 %176 }
  0xa1   :  { %205 = vrot.lane.b32.xlu1 %v184_v44, %s942_s13 }
  0xa5   :  { %397 = vrot.lane.b32.xlu1 %v376_v46, %s942_s13 }
  0xa9   :  { %399 = vrot.lane.b32.xlu1 %v379_v48, %s942_s13 }
  0xad   :  { %401 = vrot.lane.b32.xlu1 %v382_v51, %s942_s13 }
  0xb1   :  { %403 = vrot.lane.b32.xlu1 %v385_v53, %s942_s13 }
  0xb5   :  { %405 = vrot.lane.b32.xlu1 %v388_v56, %s942_s13 }
  0xb9   :  { %407 = vrot.lane.b32.xlu1 %v391_v58, %s942_s13 }
  0xbd   :  { %409 = vrot.lane.b32.xlu1 %v394_v61, %s942_s13  ;;  %s947_s13 = smov [#allocation3]  }
  0xbe   :  { %s828_s20 = sshll.u32 %s947_s13, 4  ;;  %s829_s20 = int_to_ptr.vmem [resolvable:$true] %s828_s20 }
  0xbf   :  { %s918_s22 = scalar_lea.vmem %s829_s20, 128  ;;  %p923_p1 = scmp.lt.s32.totalorder %s829_s20, %s829_s20 }
  0xc0   :  { %p919_p0 = scmp.ne.s32.totalorder %s829_s20, %s918_s22  ;;  %p924_p2 = scmp.lt.s32.totalorder %s918_s22, %s918_s22 }
  0xc2   :  { %p925_p3 = por %p924_p2, %p923_p1 }
  0xc4   :  { %p926_p4 = pnand %p925_p3, %p919_p0 }
  0xef   :  { %v204_v63 = vpop.permute.xlu0 %203 }
  0xf0   :  { %v219_v0 = vsel %vm168_vm0, %v204_v63, %v1005_v24 }
  0xf1   :  { %235 = vrot.lane.b32.xlu1 %v219_v0, %s944_s1 }
  0xf3   :  { %v396_v2 = vpop.permute.xlu0 %395 }
  0xf4   :  { %v411_v3 = vsel %vm168_vm0, %v396_v2, %v1007_v25 }
  0xf5   :  { %267 = vrot.lane.b32.xlu1 %v219_v0, %s945_s19 }
  0xf7   :  { %v208_v4 = vpop.permute.xlu0 %207 }
  0xf8   :  { %v221_v5 = vsel %vm168_vm0, %v208_v4, %v1035_v38 }
  0xf9   :  { %427 = vrot.lane.b32.xlu1 %v411_v3, %s944_s1 }
  0xfb   :  { %v210_v21 = vpop.permute.xlu0 %209 }
  0xfc   :  { %v222_v23 = vsel %vm168_vm0, %v210_v21, %v1057_v50 }
  0xfd   :  { %459 = vrot.lane.b32.xlu1 %v411_v3, %s945_s19 }
  0xff   :  { %v212_v27 = vpop.permute.xlu0 %211 }
 0x100   :  { %v223_v30 = vsel %vm168_vm0, %v212_v27, %v1077_v60 }
 0x101   :  { %239 = vrot.lane.b32.xlu1 %v221_v5, %s944_s1 }
 0x103   :  { %v214_v32 = vpop.permute.xlu0 %213 }
 0x104   :  { %v224_v34 = vsel %vm168_vm0, %v214_v32, %v1097_v6 }
 0x107   :  { %v216_v37 = vpop.permute.xlu0 %215 }
 0x108   :  { %v225_v40 = vsel %vm168_vm0, %v216_v37, %v1105_v10 }
 0x10b   :  { %v218_v42 = vpop.permute.xlu0 %217 }
 0x10c   :  { %v226_v44 = vsel %vm168_vm0, %v218_v42, %v1113_v14 }
 0x10f   :  { %v173_v7 = vpop.permute.xlu1 %172 }
 0x110   :  { %v174_v8 = vsel %vm168_vm0, %v173_v7, %v1121_v17 }
 0x111   :  { %vm1193_vm1 = vcmp.eq.s32.totalorder %v174_v8, %v177_v62 }
 0x113   :  { %v206_v12 = vpop.permute.xlu1 %205 }
 0x114   :  { %v220_v15 = vsel %vm168_vm0, %v206_v12, %v1015_v28 }
 0x115   :  { %237 = vrot.lane.b32.xlu0 %v220_v15, %s944_s1 }
 0x117   :  { %v398_v18 = vpop.permute.xlu1 %397 }
 0x118   :  { %v412_v19 = vsel %vm168_vm0, %v398_v18, %v1027_v35 }
 0x119   :  { %269 = vrot.lane.b32.xlu0 %v220_v15, %s945_s19 }
 0x11b   :  { %v400_v20 = vpop.permute.xlu1 %399 }
 0x11c   :  { %v413_v17 = vsel %vm168_vm0, %v400_v20, %v1047_v45 }
 0x11d   :  { %429 = vrot.lane.b32.xlu0 %v412_v19, %s944_s1  ;;  %431 = vrot.lane.b32.xlu1 %v413_v17, %s944_s1 }
 0x11f   :  { %v402_v22 = vpop.permute.xlu1 %401 }
 0x120   :  { %v414_v26 = vsel %vm168_vm0, %v402_v22, %v1067_v55 }
 0x121   :  { %461 = vrot.lane.b32.xlu0 %v412_v19, %s945_s19  ;;  %241 = vrot.lane.b32.xlu1 %v222_v23, %s944_s1 }
 0x123   :  { %v404_v29 = vpop.permute.xlu1 %403 }
 0x124   :  { %v415_v31 = vsel %vm168_vm0, %v404_v29, %v1087_v1 }
 0x125   :  { %271 = vrot.lane.b32.xlu0 %v221_v5, %s945_s19  ;;  %433 = vrot.lane.b32.xlu1 %v414_v26, %s944_s1 }
 0x127   :  { %v406_v33 = vpop.permute.xlu1 %405 }
 0x128   :  { %v416_v36 = vsel %vm168_vm0, %v406_v33, %v1101_v9 }
 0x129   :  { %463 = vrot.lane.b32.xlu0 %v413_v17, %s945_s19  ;;  %243 = vrot.lane.b32.xlu1 %v223_v30, %s944_s1 }
 0x12b   :  { %v408_v39 = vpop.permute.xlu1 %407 }
 0x12c   :  { %v417_v41 = vsel %vm168_vm0, %v408_v39, %v1109_v13 }
 0x12d   :  { %273 = vrot.lane.b32.xlu0 %v222_v23, %s945_s19  ;;  %435 = vrot.lane.b32.xlu1 %v415_v31, %s944_s1 }
 0x12f   :  { %v410_v43 = vpop.permute.xlu1 %409 }
 0x130   :  { %v418_v46 = vsel %vm168_vm0, %v410_v43, %v1117_v16 }
 0x131   :  { %465 = vrot.lane.b32.xlu0 %v414_v26, %s945_s19  ;;  %245 = vrot.lane.b32.xlu1 %v224_v34, %s944_s1 }
 0x135   :  { %275 = vrot.lane.b32.xlu0 %v223_v30, %s945_s19  ;;  %437 = vrot.lane.b32.xlu1 %v416_v36, %s944_s1 }
 0x139   :  { %467 = vrot.lane.b32.xlu0 %v415_v31, %s945_s19  ;;  %247 = vrot.lane.b32.xlu1 %v225_v40, %s944_s1 }
 0x13d   :  { %277 = vrot.lane.b32.xlu0 %v224_v34, %s945_s19  ;;  %439 = vrot.lane.b32.xlu1 %v417_v41, %s944_s1 }
 0x141   :  { %469 = vrot.lane.b32.xlu0 %v416_v36, %s945_s19  ;;  %249 = vrot.lane.b32.xlu1 %v226_v44, %s944_s1 }
 0x145   :  { %279 = vrot.lane.b32.xlu0 %v225_v40, %s945_s19  ;;  %441 = vrot.lane.b32.xlu1 %v418_v46, %s944_s1 }
 0x149   :  { %471 = vrot.lane.b32.xlu0 %v417_v41, %s945_s19 }
 0x14d   :  { %281 = vrot.lane.b32.xlu0 %v226_v44, %s945_s19 }
 0x151   :  { %473 = vrot.lane.b32.xlu0 %v418_v46, %s945_s19 }
 0x163   :  { %v236_v47 = vpop.permute.xlu1 %235 }
 0x164   :  { %v259_v48 = vadd.f32 %v236_v47, %v1005_v24 }
 0x166   :  { %307 = vrot.lane.b32.xlu1 %v259_v48, %s943_s0 }
 0x167   :  { %v268_v49 = vpop.permute.xlu1 %267 }
 0x168   :  { %v291_v51 = vsub.f32 %v1005_v24, %v268_v49 }
 0x16a   :  { %339 = vrot.lane.b32.xlu1 %v291_v51, %s943_s0 }
 0x16b   :  { %v428_v52 = vpop.permute.xlu1 %427 }
 0x16c   :  { %v451_v53 = vadd.f32 %v428_v52, %v1007_v25 }
 0x16e   :  { %499 = vrot.lane.b32.xlu1 %v451_v53, %s943_s0 }
 0x16f   :  { %v460_v54 = vpop.permute.xlu1 %459 }
 0x170   :  { %v483_v56 = vsub.f32 %v1007_v25, %v460_v54 }
 0x172   :  { %531 = vrot.lane.b32.xlu1 %v483_v56, %s943_s0 }
 0x173   :  { %v240_v57 = vpop.permute.xlu1 %239 }
 0x174   :  { %v261_v58 = vadd.f32 %v240_v57, %v1035_v38 }
 0x176   :  { %311 = vrot.lane.b32.xlu1 %v261_v58, %s943_s0 }
 0x187   :  { %v238_v59 = vpop.permute.xlu0 %237 }
 0x188   :  { %v260_v24 = vadd.f32 %v238_v59, %v1015_v28 }
 0x18a   :  { %309 = vrot.lane.b32.xlu0 %v260_v24, %s943_s0 }
 0x18b   :  { %v270_v61 = vpop.permute.xlu0 %269 }
 0x18c   :  { %v292_v62 = vsub.f32 %v1015_v28, %v270_v61 }
 0x18e   :  { %341 = vrot.lane.b32.xlu0 %v292_v62, %s943_s0 }
 0x18f   :  { %v432_v63 = vpop.permute.xlu1 %431  ;;  %v430_v0 = vpop.permute.xlu0 %429 }
 0x190   :  { %v453_v25 = vadd.f32 %v432_v63, %v1047_v45  ;;  %v452_v2 = vadd.f32 %v430_v0, %v1027_v35 }
 0x192   :  { %503 = vrot.lane.b32.xlu1 %v453_v25, %s943_s0  ;;  %501 = vrot.lane.b32.xlu0 %v452_v2, %s943_s0 }
 0x193   :  { %v242_v3 = vpop.permute.xlu1 %241  ;;  %v462_v4 = vpop.permute.xlu0 %461 }
 0x194   :  { %v262_v5 = vadd.f32 %v242_v3, %v1057_v50  ;;  %v484_v7 = vsub.f32 %v1027_v35, %v462_v4 }
 0x196   :  { %313 = vrot.lane.b32.xlu1 %v262_v5, %s943_s0  ;;  %533 = vrot.lane.b32.xlu0 %v484_v7, %s943_s0 }
 0x197   :  { %v434_v28 = vpop.permute.xlu1 %433  ;;  %v272_v8 = vpop.permute.xlu0 %271 }
 0x198   :  { %v454_v12 = vadd.f32 %v434_v28, %v1067_v55  ;;  %v293_v15 = vsub.f32 %v1035_v38, %v272_v8 }
 0x19a   :  { %505 = vrot.lane.b32.xlu1 %v454_v12, %s943_s0  ;;  %343 = vrot.lane.b32.xlu0 %v293_v15, %s943_s0 }
 0x19b   :  { %v244_v18 = vpop.permute.xlu1 %243  ;;  %v464_v19 = vpop.permute.xlu0 %463 }
 0x19c   :  { %v263_v20 = vadd.f32 %v244_v18, %v1077_v60  ;;  %v485_v35 = vsub.f32 %v1047_v45, %v464_v19 }
 0x19e   :  { %315 = vrot.lane.b32.xlu1 %v263_v20, %s943_s0  ;;  %535 = vrot.lane.b32.xlu0 %v485_v35, %s943_s0 }
 0x19f   :  { %v436_v17 = vpop.permute.xlu1 %435  ;;  %v274_v21 = vpop.permute.xlu0 %273 }
 0x1a0   :  { %v455_v22 = vadd.f32 %v436_v17, %v1087_v1  ;;  %v294_v38 = vsub.f32 %v1057_v50, %v274_v21 }
 0x1a2   :  { %507 = vrot.lane.b32.xlu1 %v455_v22, %s943_s0  ;;  %345 = vrot.lane.b32.xlu0 %v294_v38, %s943_s0 }
 0x1a3   :  { %v246_v23 = vpop.permute.xlu1 %245  ;;  %v466_v26 = vpop.permute.xlu0 %465 }
 0x1a4   :  { %v264_v27 = vadd.f32 %v246_v23, %v1097_v6  ;;  %v486_v45 = vsub.f32 %v1067_v55, %v466_v26 }
 0x1a6   :  { %317 = vrot.lane.b32.xlu1 %v264_v27, %s943_s0  ;;  %537 = vrot.lane.b32.xlu0 %v486_v45, %s943_s0 }
 0x1a7   :  { %v438_v29 = vpop.permute.xlu1 %437  ;;  %v276_v30 = vpop.permute.xlu0 %275 }
 0x1a8   :  { %v456_v31 = vadd.f32 %v438_v29, %v1101_v9  ;;  %v295_v50 = vsub.f32 %v1077_v60, %v276_v30 }
 0x1aa   :  { %509 = vrot.lane.b32.xlu1 %v456_v31, %s943_s0  ;;  %347 = vrot.lane.b32.xlu0 %v295_v50, %s943_s0 }
 0x1ab   :  { %v248_v32 = vpop.permute.xlu1 %247  ;;  %v468_v33 = vpop.permute.xlu0 %467 }
 0x1ac   :  { %v265_v34 = vadd.f32 %v248_v32, %v1105_v10  ;;  %v487_v55 = vsub.f32 %v1087_v1, %v468_v33 }
 0x1ae   :  { %319 = vrot.lane.b32.xlu1 %v265_v34, %s943_s0  ;;  %539 = vrot.lane.b32.xlu0 %v487_v55, %s943_s0 }
 0x1af   :  { %v440_v36 = vpop.permute.xlu1 %439  ;;  %v278_v37 = vpop.permute.xlu0 %277 }
 0x1b0   :  { %v457_v39 = vadd.f32 %v440_v36, %v1109_v13  ;;  %v296_v60 = vsub.f32 %v1097_v6, %v278_v37 }
 0x1b2   :  { %511 = vrot.lane.b32.xlu1 %v457_v39, %s943_s0  ;;  %349 = vrot.lane.b32.xlu0 %v296_v60, %s943_s0 }
 0x1b3   :  { %v250_v40 = vpop.permute.xlu1 %249  ;;  %v470_v41 = vpop.permute.xlu0 %469 }
 0x1b4   :  { %v266_v42 = vadd.f32 %v250_v40, %v1113_v14  ;;  %v488_v1 = vsub.f32 %v1101_v9, %v470_v41 }
 0x1b6   :  { %321 = vrot.lane.b32.xlu1 %v266_v42, %s943_s0  ;;  %541 = vrot.lane.b32.xlu0 %v488_v1, %s943_s0 }
 0x1b7   :  { %v280_v43 = vpop.permute.xlu0 %279  ;;  %v442_v44 = vpop.permute.xlu1 %441 }
 0x1b8   :  { %v297_v46 = vsub.f32 %v1105_v10, %v280_v43  ;;  %v458_v6 = vadd.f32 %v442_v44, %v1117_v16  ;;  %v946_v10 = vmov 0.0  }
 0x1b9   :  { %720 = vst.msk [vmem:[#allocation2] sm:$0xff] %vm719_vm2, %v946_v10  ;;  %721 = vst.msk [vmem:[#allocation2 + $0x8] sm:$0xff] %vm719_vm2, %v946_v10 }
 0x1ba   :  { %351 = vrot.lane.b32.xlu0 %v297_v46, %s943_s0  ;;  %513 = vrot.lane.b32.xlu1 %v458_v6, %s943_s0  ;;  %722 = vst.msk [vmem:[#allocation2 + $0x10] sm:$0xff] %vm719_vm2, %v946_v10  ;;  %723 = vst.msk [vmem:[#allocation2 + $0x18] sm:$0xff] %vm719_vm2, %v946_v10 }
 0x1bb   :  { %v472_v47 = vpop.permute.xlu0 %471  ;;  %724 = vst.msk [vmem:[#allocation2 + $0x20] sm:$0xff] %vm719_vm2, %v946_v10  ;;  %725 = vst.msk [vmem:[#allocation2 + $0x28] sm:$0xff] %vm719_vm2, %v946_v10 }
 0x1bc   :  { %v489_v48 = vsub.f32 %v1109_v13, %v472_v47  ;;  %726 = vst.msk [vmem:[#allocation2 + $0x30] sm:$0xff] %vm719_vm2, %v946_v10  ;;  %727 = vst.msk [vmem:[#allocation2 + $0x38] sm:$0xff] %vm719_vm2, %v946_v10 }
 0x1be   :  { %543 = vrot.lane.b32.xlu0 %v489_v48, %s943_s0 }
 0x1bf   :  { %v282_v9 = vpop.permute.xlu0 %281 }
 0x1c0   :  { %v298_v49 = vsub.f32 %v1113_v14, %v282_v9 }
 0x1c2   :  { %353 = vrot.lane.b32.xlu0 %v298_v49, %s943_s0 }
 0x1c3   :  { %v474_v51 = vpop.permute.xlu0 %473 }
 0x1c4   :  { %v490_v52 = vsub.f32 %v1117_v16, %v474_v51 }
 0x1c6   :  { %545 = vrot.lane.b32.xlu0 %v490_v52, %s943_s0 }
 0x1d8   :  { %v308_v13 = vpop.permute.xlu1 %307 }
 0x1dc   :  { %v340_v14 = vpop.permute.xlu1 %339 }
 0x1dd   :  { %v363_v16 = vsel %vm1193_vm1, %v308_v13, %v340_v14 }
 0x1de   :  { %v563_v53 = vmul.f32 %v363_v16, %v363_v16 }
 0x1e0   :  { %v571_v54 = vadd.f32 1e-06, %v563_v53  ;;  %v500_v56 = vpop.permute.xlu1 %499 }
 0x1e2   :  { %886 = vrsqrt.f32 %v571_v54  ;;  %vm581_vm3 = vcmp.eq.f32.partialorder %v571_v54, inf  ;;  %v584_v2 = vand.u32 2147483648, %v571_v54  ;;  %vm583_vm5 = vcmp.eq.f32.partialorder %v571_v54, 0.0 }
 0x1e4   :  { %v532_v57 = vpop.permute.xlu1 %531 }
 0x1e5   :  { %v555_v58 = vsel %vm1193_vm1, %v500_v56, %v532_v57 }
 0x1e6   :  { %v635_v59 = vmul.f32 %v555_v58, %v555_v58 }
 0x1e8   :  { %v643_v24 = vadd.f32 1e-06, %v635_v59  ;;  %v312_v12 = vpop.permute.xlu1 %311 }
 0x1ea   :  { %888 = vrsqrt.f32 %v643_v24  ;;  %vm653_vm4 = vcmp.eq.f32.partialorder %v643_v24, inf  ;;  %v656_v3 = vand.u32 2147483648, %v643_v24  ;;  %vm655_vm6 = vcmp.eq.f32.partialorder %v643_v24, 0.0 }
 0x1ec   :  { %v887_v61 = vpop.eup %886 }
 0x1ed   :  { %v580_v62 = vmul.f32 %v887_v61, %v571_v54 }
 0x1ef   :  { %v582_v0 = vsel %vm581_vm3, %v571_v54, %v580_v62 }
 0x1f0   :  { %v585_v5 = vsel %vm583_vm5, %v584_v2, %v582_v0 }
 0x1f4   :  { %v889_v63 = vpop.eup %888 }
 0x1f5   :  { %v652_v25 = vmul.f32 %v889_v63, %v643_v24 }
 0x1f7   :  { %v654_v4 = vsel %vm653_vm4, %v643_v24, %v652_v25 }
 0x1f8   :  { %v657_v7 = vsel %vm655_vm6, %v656_v3, %v654_v4 }
 0x1f9   :  { %v707_v28 = vadd.f32 %v657_v7, %v585_v5 }
 0x1fb   :  { %744 = vrot.lane.b32.xlu1 %v707_v28, %s944_s1 }
 0x1fc   :  { %v310_v8 = vpop.permute.xlu0 %309 }
 0x200   :  { %v342_v15 = vpop.permute.xlu0 %341 }
 0x201   :  { %v364_v18 = vsel %vm1193_vm1, %v310_v8, %v342_v15 }
 0x202   :  { %v564_v19 = vmul.f32 %v364_v18, %v364_v18 }
 0x204   :  { %v572_v20 = vadd.f32 1e-06, %v564_v19  ;;  %v504_v35 = vpop.permute.xlu1 %503  ;;  %v502_v17 = vpop.permute.xlu0 %501 }
 0x206   :  { %890 = vrsqrt.f32 %v572_v20  ;;  %vm588_vm7 = vcmp.eq.f32.partialorder %v572_v20, inf  ;;  %v591_v6 = vand.u32 2147483648, %v572_v20  ;;  %vm590_vm9 = vcmp.eq.f32.partialorder %v572_v20, 0.0 }
 0x208   :  { %v314_v21 = vpop.permute.xlu1 %313  ;;  %v534_v22 = vpop.permute.xlu0 %533 }
 0x209   :  { %v556_v38 = vsel %vm1193_vm1, %v502_v17, %v534_v22 }
 0x20a   :  { %v636_v23 = vmul.f32 %v556_v38, %v556_v38 }
 0x20c   :  { %v644_v26 = vadd.f32 1e-06, %v636_v23  ;;  %v506_v27 = vpop.permute.xlu1 %505  ;;  %v344_v45 = vpop.permute.xlu0 %343 }
 0x20d   :  { %v365_v29 = vsel %vm1193_vm1, %v312_v12, %v344_v45 }
 0x20e   :  { %892 = vrsqrt.f32 %v644_v26  ;;  %v565_v30 = vmul.f32 %v365_v29, %v365_v29  ;;  %vm660_vm8 = vcmp.eq.f32.partialorder %v644_v26, inf  ;;  %v663_v49 = vand.u32 2147483648, %v644_v26 }
 0x20f   :  { %vm662_vm10 = vcmp.eq.f32.partialorder %v644_v26, 0.0 }
 0x210   :  { %v573_v31 = vadd.f32 1e-06, %v565_v30  ;;  %v316_v50 = vpop.permute.xlu1 %315  ;;  %v536_v32 = vpop.permute.xlu0 %535 }
 0x211   :  { %v557_v33 = vsel %vm1193_vm1, %v504_v35, %v536_v32  ;;  %v891_v34 = vpop.eup %890 }
 0x212   :  { %894 = vrsqrt.f32 %v573_v31  ;;  %v637_v55 = vmul.f32 %v557_v33, %v557_v33  ;;  %v587_v40 = vmul.f32 %v891_v34, %v572_v20  ;;  %vm595_vm11 = vcmp.eq.f32.partialorder %v573_v31, inf }
 0x213   :  { %v598_v0 = vand.u32 2147483648, %v573_v31  ;;  %vm597_vm13 = vcmp.eq.f32.partialorder %v573_v31, 0.0 }
 0x214   :  { %v645_v36 = vadd.f32 1e-06, %v637_v55  ;;  %v508_v37 = vpop.permute.xlu1 %507  ;;  %v346_v39 = vpop.permute.xlu0 %345  ;;  %v589_v46 = vsel %vm588_vm7, %v572_v20, %v587_v40 }
 0x215   :  { %v366_v60 = vsel %vm1193_vm1, %v314_v21, %v346_v39  ;;  %v592_v14 = vsel %vm590_vm9, %v591_v6, %v589_v46 }
 0x216   :  { %896 = vrsqrt.f32 %v645_v36  ;;  %v566_v41 = vmul.f32 %v366_v60, %v366_v60  ;;  %vm667_vm12 = vcmp.eq.f32.partialorder %v645_v36, inf  ;;  %v670_v3 = vand.u32 2147483648, %v645_v36 }
 0x217   :  { %vm669_vm14 = vcmp.eq.f32.partialorder %v645_v36, 0.0 }
 0x218   :  { %v893_v42 = vpop.eup %892  ;;  %v1337_v1 = vadd.f32 1e-06, %v566_v41  ;;  %v538_v43 = vpop.permute.xlu0 %537 }
 0x219   :  { %v558_v44 = vsel %vm1193_vm1, %v506_v27, %v538_v43  ;;  %v659_v47 = vmul.f32 %v893_v42, %v644_v26  ;;  %v318_v48 = vpop.permute.xlu1 %317 }
 0x21a   :  { %898 = vrsqrt.f32 %v1337_v1  ;;  %v638_v9 = vmul.f32 %v558_v44, %v558_v44  ;;  %vm602_vm15 = vcmp.eq.f32.partialorder %v1337_v1, inf  ;;  %vm604_vm3 = vcmp.eq.f32.partialorder %v1337_v1, 0.0 }
 0x21b   :  { %v661_v51 = vsel %vm660_vm8, %v644_v26, %v659_v47  ;;  %v605_v26 = vand.u32 2147483648, %v1337_v1 }
 0x21c   :  { %v895_v52 = vpop.eup %894  ;;  %v646_v10 = vadd.f32 1e-06, %v638_v9  ;;  %v348_v13 = vpop.permute.xlu0 %347  ;;  %v664_v16 = vsel %vm662_vm10, %v663_v49, %v661_v51 }
 0x21d   :  { %v367_v53 = vsel %vm1193_vm1, %v316_v50, %v348_v13  ;;  %v708_v54 = vadd.f32 %v664_v16, %v592_v14  ;;  %v594_v56 = vmul.f32 %v895_v52, %v573_v31  ;;  %v510_v59 = vpop.permute.xlu1 %509 }
 0x21e   :  { %900 = vrsqrt.f32 %v646_v10  ;;  %v567_v57 = vmul.f32 %v367_v53, %v367_v53  ;;  %vm674_vm0 = vcmp.eq.f32.partialorder %v646_v10, inf  ;;  %v677_v29 = vand.u32 2147483648, %v646_v10 }
 0x21f   :  { %746 = vrot.lane.b32.xlu0 %v708_v54, %s944_s1  ;;  %v596_v63 = vsel %vm595_vm11, %v573_v31, %v594_v56  ;;  %vm676_vm4 = vcmp.eq.f32.partialorder %v646_v10, 0.0 }
 0x220   :  { %v897_v58 = vpop.eup %896  ;;  %v1345_v24 = vadd.f32 1e-06, %v567_v57  ;;  %v540_v61 = vpop.permute.xlu0 %539  ;;  %v599_v8 = vsel %vm597_vm13, %v598_v0, %v596_v63 }
 0x221   :  { %v559_v62 = vsel %vm1193_vm1, %v508_v37, %v540_v61  ;;  %v666_v25 = vmul.f32 %v897_v58, %v645_v36  ;;  %v320_v20 = vpop.permute.xlu1 %319 }
 0x222   :  { %902 = vrsqrt.f32 %v1345_v24  ;;  %v639_v2 = vmul.f32 %v559_v62, %v559_v62  ;;  %vm609_vm5 = vcmp.eq.f32.partialorder %v1345_v24, inf  ;;  %v612_v44 = vand.u32 2147483648, %v1345_v24 }
 0x223   :  { %v668_v4 = vsel %vm667_vm12, %v645_v36, %v666_v25  ;;  %vm611_vm7 = vcmp.eq.f32.partialorder %v1345_v24, 0.0 }
 0x224   :  { %v899_v5 = vpop.eup %898  ;;  %v647_v7 = vadd.f32 1e-06, %v639_v2  ;;  %v350_v28 = vpop.permute.xlu0 %349  ;;  %v671_v12 = vsel %vm669_vm14, %v670_v3, %v668_v4 }
 0x225   :  { %v368_v15 = vsel %vm1193_vm1, %v318_v48, %v350_v28  ;;  %v709_v18 = vadd.f32 %v671_v12, %v599_v8  ;;  %v601_v19 = vmul.f32 %v899_v5, %v1337_v1  ;;  %v512_v50 = vpop.permute.xlu1 %511 }
 0x226   :  { %904 = vrsqrt.f32 %v647_v7  ;;  %v568_v35 = vmul.f32 %v368_v15, %v368_v15  ;;  %vm681_vm6 = vcmp.eq.f32.partialorder %v647_v7, inf  ;;  %v684_v48 = vand.u32 2147483648, %v647_v7 }
 0x227   :  { %748 = vrot.lane.b32.xlu1 %v709_v18, %s944_s1  ;;  %v603_v23 = vsel %vm602_vm15, %v1337_v1, %v601_v19  ;;  %vm683_vm8 = vcmp.eq.f32.partialorder %v647_v7, 0.0 }
 0x228   :  { %v901_v17 = vpop.eup %900  ;;  %v1354_v21 = vadd.f32 1e-06, %v568_v35  ;;  %v542_v22 = vpop.permute.xlu0 %541  ;;  %v606_v34 = vsel %vm604_vm3, %v605_v26, %v603_v23 }
 0x229   :  { %v560_v38 = vsel %vm1193_vm1, %v510_v59, %v542_v22  ;;  %v673_v27 = vmul.f32 %v901_v17, %v646_v10  ;;  %v322_v6 = vpop.permute.xlu1 %321 }
 0x22a   :  { %906 = vrsqrt.f32 %v1354_v21  ;;  %v640_v45 = vmul.f32 %v560_v38, %v560_v38  ;;  %vm616_vm9 = vcmp.eq.f32.partialorder %v1354_v21, inf  ;;  %v619_v62 = vand.u32 2147483648, %v1354_v21 }
 0x22b   :  { %v675_v30 = vsel %vm674_vm0, %v646_v10, %v673_v27  ;;  %vm618_vm11 = vcmp.eq.f32.partialorder %v1354_v21, 0.0 }
 0x22c   :  { %v903_v31 = vpop.eup %902  ;;  %v648_v32 = vadd.f32 1e-06, %v640_v45  ;;  %v352_v33 = vpop.permute.xlu0 %351  ;;  %v678_v55 = vsel %vm676_vm4, %v677_v29, %v675_v30 }
 0x22d   :  { %v369_v36 = vsel %vm1193_vm1, %v320_v20, %v352_v33  ;;  %v710_v37 = vadd.f32 %v678_v55, %v606_v34  ;;  %v608_v39 = vmul.f32 %v903_v31, %v1345_v24  ;;  %v514_v56 = vpop.permute.xlu1 %513  ;;  %v728_v33 = vld [vmem:[#allocation2] sm:$0xff] }
 0x22e   :  { %908 = vrsqrt.f32 %v648_v32  ;;  %v569_v60 = vmul.f32 %v369_v36, %v369_v36  ;;  %vm688_vm10 = vcmp.eq.f32.partialorder %v648_v32, inf  ;;  %v691_v25 = vand.u32 2147483648, %v648_v32  ;;  %v729_v36 = vld [vmem:[#allocation2 + $0x8] sm:$0xff] }
 0x22f   :  { %750 = vrot.lane.b32.xlu0 %v710_v37, %s944_s1  ;;  %v610_v43 = vsel %vm609_vm5, %v1345_v24, %v608_v39  ;;  %vm690_vm12 = vcmp.eq.f32.partialorder %v648_v32, 0.0 }
 0x230   :  { %v905_v40 = vpop.eup %904  ;;  %v1367_v41 = vadd.f32 1e-06, %v569_v60  ;;  %v544_v42 = vpop.permute.xlu0 %543  ;;  %v613_v10 = vsel %vm611_vm7, %v612_v44, %v610_v43  ;;  %v730_v60 = vld [vmem:[#allocation2 + $0x10] sm:$0xff]  ;;  %v732_v44 = vld [vmem:[#allocation2 + $0x20] sm:$0xff] }
 0x231   :  { %v561_v1 = vsel %vm1193_vm1, %v512_v50, %v544_v42  ;;  %v680_v46 = vmul.f32 %v905_v40, %v647_v7  ;;  %v731_v42 = vld [vmem:[#allocation2 + $0x18] sm:$0xff] }
 0x232   :  { %910 = vrsqrt.f32 %v1367_v41  ;;  %v641_v47 = vmul.f32 %v561_v1, %v561_v1  ;;  %v626_v18 = vand.u32 2147483648, %v1367_v41  ;;  %vm625_vm14 = vcmp.eq.f32.partialorder %v1367_v41, 0.0 }
 0x233   :  { %v682_v9 = vsel %vm681_vm6, %v647_v7, %v680_v46 }
 0x234   :  { %v907_v49 = vpop.eup %906  ;;  %v649_v51 = vadd.f32 1e-06, %v641_v47  ;;  %v354_v52 = vpop.permute.xlu0 %353  ;;  %v685_v13 = vsel %vm683_vm8, %v684_v48, %v682_v9  ;;  %v733_v47 = vld [vmem:[#allocation2 + $0x28] sm:$0xff] }
 0x235   :  { %v370_v14 = vsel %vm1193_vm1, %v322_v6, %v354_v52  ;;  %v711_v16 = vadd.f32 %v685_v13, %v613_v10  ;;  %v615_v53 = vmul.f32 %v907_v49, %v1354_v21  ;;  %v734_v49 = vld [vmem:[#allocation2 + $0x30] sm:$0xff] }
 0x236   :  { %912 = vrsqrt.f32 %v649_v51  ;;  %v570_v54 = vmul.f32 %v370_v14, %v370_v14  ;;  %vm695_vm13 = vcmp.eq.f32.partialorder %v649_v51, inf  ;;  %v698_v19 = vand.u32 2147483648, %v649_v51 }
 0x237   :  { %752 = vrot.lane.b32.xlu1 %v711_v16, %s944_s1  ;;  %v617_v61 = vsel %vm616_vm9, %v1354_v21, %v615_v53  ;;  %vm697_vm15 = vcmp.eq.f32.partialorder %v649_v51, 0.0  ;;  %v735_v53 = vld [vmem:[#allocation2 + $0x38] sm:$0xff] }
 0x238   :  { %v909_v57 = vpop.eup %908  ;;  %v578_v58 = vadd.f32 1e-06, %v570_v54  ;;  %v546_v59 = vpop.permute.xlu0 %545  ;;  %v620_v5 = vsel %vm618_vm11, %v619_v62, %v617_v61 }
 0x239   :  { %v562_v24 = vsel %vm1193_vm1, %v514_v56, %v546_v59  ;;  %v687_v63 = vmul.f32 %v909_v57, %v648_v32  ;;  %vm623_vm1 = vcmp.eq.f32.partialorder %v1367_v41, inf }
 0x23a   :  { %914 = vrsqrt.f32 %v578_v58  ;;  %v642_v0 = vmul.f32 %v562_v24, %v562_v24  ;;  %vm630_vm0 = vcmp.eq.f32.partialorder %v578_v58, inf  ;;  %v633_v45 = vand.u32 2147483648, %v578_v58 }
 0x23b   :  { %v689_v2 = vsel %vm688_vm10, %v648_v32, %v687_v63  ;;  %vm632_vm4 = vcmp.eq.f32.partialorder %v578_v58, 0.0 }
 0x23c   :  { %v911_v3 = vpop.eup %910  ;;  %v650_v4 = vadd.f32 1e-06, %v642_v0  ;;  %v692_v7 = vsel %vm690_vm12, %v691_v25, %v689_v2 }
 0x23d   :  { %v712_v28 = vadd.f32 %v692_v7, %v620_v5  ;;  %v622_v11 = vmul.f32 %v911_v3, %v1367_v41 }
 0x23e   :  { %916 = vrsqrt.f32 %v650_v4  ;;  %vm702_vm3 = vcmp.eq.f32.partialorder %v650_v4, inf  ;;  %v705_v29 = vand.u32 2147483648, %v650_v4  ;;  %vm704_vm5 = vcmp.eq.f32.partialorder %v650_v4, 0.0 }
 0x23f   :  { %754 = vrot.lane.b32.xlu0 %v712_v28, %s944_s1  ;;  %v624_v12 = vsel %vm623_vm1, %v1367_v41, %v622_v11 }
 0x240   :  { %v913_v8 = vpop.eup %912  ;;  %v627_v17 = vsel %vm625_vm14, %v626_v18, %v624_v12 }
 0x241   :  { %v694_v15 = vmul.f32 %v913_v8, %v649_v51 }
 0x243   :  { %v696_v20 = vsel %vm695_vm13, %v649_v51, %v694_v15 }
 0x244   :  { %v915_v35 = vpop.eup %914  ;;  %v699_v21 = vsel %vm697_vm15, %v698_v19, %v696_v20 }
 0x245   :  { %v713_v22 = vadd.f32 %v699_v21, %v627_v17  ;;  %v629_v38 = vmul.f32 %v915_v35, %v578_v58 }
 0x247   :  { %756 = vrot.lane.b32.xlu1 %v713_v22, %s944_s1  ;;  %v631_v26 = vsel %vm630_vm0, %v578_v58, %v629_v38 }
 0x248   :  { %v917_v23 = vpop.eup %916  ;;  %v634_v31 = vsel %vm632_vm4, %v633_v45, %v631_v26 }
 0x249   :  { %v701_v27 = vmul.f32 %v917_v23, %v650_v4 }
 0x24b   :  { %v703_v30 = vsel %vm702_vm3, %v650_v4, %v701_v27 }
 0x24c   :  { %v706_v50 = vsel %vm704_vm5, %v705_v29, %v703_v30 }
 0x24d   :  { %v714_v32 = vadd.f32 %v706_v50, %v634_v31 }
 0x24f   :  { %758 = vrot.lane.b32.xlu0 %v714_v32, %s944_s1 }
 0x26d   :  { %v745_v34 = vpop.permute.xlu1 %744 }
 0x26e   :  { %v768_v55 = vadd.f32 %v745_v34, %v728_v33 }
 0x270   :  { %777 = vst.msk [vmem:[#allocation2] sm:$0xff] %vm719_vm2, %v768_v55 }
 0x277   :  { %v788_v13 = vld [vmem:[#allocation2] sm:$0xff] }
 0x278   :  { %v796_v56 = vsel %vm719_vm2, %v788_v13, 0.0 }
 0x291   :  { %v747_v37 = vpop.permute.xlu0 %746 }
 0x292   :  { %v769_v39 = vadd.f32 %v747_v37, %v729_v36 }
 0x294   :  { %778 = vst.msk [vmem:[#allocation2 + $0x8] sm:$0xff] %vm719_vm2, %v769_v39 }
 0x299   :  { %v749_v40 = vpop.permute.xlu1 %748 }
 0x29a   :  { %v770_v41 = vadd.f32 %v749_v40, %v730_v60 }
 0x29b   :  { %v789_v10 = vld [vmem:[#allocation2 + $0x8] sm:$0xff] }
 0x29c   :  { %779 = vst.msk [vmem:[#allocation2 + $0x10] sm:$0xff] %vm719_vm2, %v770_v41  ;;  %v797_v16 = vsel %vm719_vm2, %v789_v10, 0.0 }
 0x29d   :  { %v798_v24 = vadd.f32 %v797_v16, %v796_v56 }
 0x2a1   :  { %v751_v1 = vpop.permute.xlu0 %750 }
 0x2a2   :  { %v771_v43 = vadd.f32 %v751_v1, %v731_v42 }
 0x2a3   :  { %v790_v14 = vld [vmem:[#allocation2 + $0x10] sm:$0xff] }
 0x2a4   :  { %780 = vst.msk [vmem:[#allocation2 + $0x18] sm:$0xff] %vm719_vm2, %v771_v43  ;;  %v799_v57 = vsel %vm719_vm2, %v790_v14, 0.0 }
 0x2a5   :  { %v800_v0 = vadd.f32 %v799_v57, %v798_v24 }
 0x2a9   :  { %v753_v46 = vpop.permute.xlu1 %752 }
 0x2aa   :  { %v772_v6 = vadd.f32 %v753_v46, %v732_v44 }
 0x2ab   :  { %v791_v54 = vld [vmem:[#allocation2 + $0x18] sm:$0xff] }
 0x2ac   :  { %781 = vst.msk [vmem:[#allocation2 + $0x20] sm:$0xff] %vm719_vm2, %v772_v6  ;;  %v801_v62 = vsel %vm719_vm2, %v791_v54, 0.0 }
 0x2ad   :  { %v802_v3 = vadd.f32 %v801_v62, %v800_v0 }
 0x2b1   :  { %v755_v48 = vpop.permute.xlu0 %754 }
 0x2b2   :  { %v773_v9 = vadd.f32 %v755_v48, %v733_v47 }
 0x2b3   :  { %v792_v59 = vld [vmem:[#allocation2 + $0x20] sm:$0xff] }
 0x2b4   :  { %782 = vst.msk [vmem:[#allocation2 + $0x28] sm:$0xff] %vm719_vm2, %v773_v9  ;;  %v803_v25 = vsel %vm719_vm2, %v792_v59, 0.0 }
 0x2b5   :  { %v804_v5 = vadd.f32 %v803_v25, %v802_v3 }
 0x2b9   :  { %v757_v51 = vpop.permute.xlu1 %756 }
 0x2ba   :  { %v774_v52 = vadd.f32 %v757_v51, %v734_v49 }
 0x2bb   :  { %v793_v63 = vld [vmem:[#allocation2 + $0x28] sm:$0xff] }
 0x2bc   :  { %783 = vst.msk [vmem:[#allocation2 + $0x30] sm:$0xff] %vm719_vm2, %v774_v52  ;;  %v805_v4 = vsel %vm719_vm2, %v793_v63, 0.0 }
 0x2bd   :  { %v806_v28 = vadd.f32 %v805_v4, %v804_v5 }
 0x2c1   :  { %v759_v58 = vpop.permute.xlu0 %758 }
 0x2c2   :  { %v775_v61 = vadd.f32 %v759_v58, %v735_v53 }
 0x2c3   :  { %v794_v2 = vld [vmem:[#allocation2 + $0x30] sm:$0xff] }
 0x2c4   :  { %784 = vst.msk [vmem:[#allocation2 + $0x38] sm:$0xff] %vm719_vm2, %v775_v61  ;;  %v807_v7 = vsel %vm719_vm2, %v794_v2, 0.0 }
 0x2c5   :  { %v808_v8 = vadd.f32 %v807_v7, %v806_v28 }
 0x2cb   :  { %v795_v11 = vld [vmem:[#allocation2 + $0x38] sm:$0xff] }
 0x2cc   :  { %v809_v12 = vsel %vm719_vm2, %v795_v11, 0.0 }
 0x2cd   :  { %v810_v15 = vadd.f32 %v809_v12, %v808_v8 }
 0x2cf   :  { %811 = vadd.xlane.f32.xlu1 %v810_v15 }
 0x35c   :  { %v812_v18 = vpop.xlane.xlu1 %811 }
 0x35d   :  { %v813_v19 = vrot.slane %v812_v18, 4 }
 0x35f   :  { %v814_v20 = vadd.f32 %v813_v19, %v812_v18 }
 0x361   :  { %v815_v35 = vrot.slane %v814_v20, 2 }
 0x363   :  { %v816_v17 = vadd.f32 %v815_v35, %v814_v20 }
 0x365   :  { %v817_v21 = vrot.slane %v816_v17, 1 }
 0x367   :  { %v818_v22 = vadd.f32 %v817_v21, %v816_v17 }
 0x369   :  { %878 = vpush %v818_v22 }
 0x39a   :  { %s879_s21 = spop %878 }
 0x39b   :  { %v820_v38 = vstv %s879_s21 }
 0x39c   :  { %821 = vst [vmem:[#allocation3] sm:$0xff] %v820_v38 }
 0x39d   :  { %929 = shalt.err (!%p926_p4)
}
 0x39e   :  { %s930_s25 = scalar_lea.hbm %s1424_s2, 128 }
 0x39f   :  { %p931_p5 = scmp.ne.s32.totalorder %s1424_s2, %s930_s25  ;;  %p934_p6 = scmp.lt.u32.totalorder %s930_s25, %s1424_s2 }
 0x3a1   :  { %p936_p7 = pnand %p934_p6, %p931_p5 }
 0x3a3   :  { %939 = shalt.err (!%p936_p7)
}
 0x3a4   :  { %831 = dma.vmem_to_hbm [thread:$0]  %s829_s20, 128, %s1424_s2, [#allocation4]  }
 0x3a5   :  { %940 = dma.done.wait [#allocation4], 128  }
 0x3a6   :  { %941 = vsyncadd [#allocation4], 4294967168 }
 0x3a7   :  { %835 = vsyncpa [#allocation4], 1 }

</bundles_post_ra>
